<compile_context>
chip_gen: v5e
topology: v5e:2x2
jax: 0.10.0
libtpu: 0.0.40
codegen_flags: <defaults>
</compile_context>

<pallas_src>
import functools

import jax
import jax.numpy as jnp
from jax import lax
from jax.experimental import pallas as pl
from jax.experimental.pallas import tpu as pltpu

_LANES = 128


def _round_up(x, m):
    return (x + m - 1) // m * m


def _pick_sub_rows(tile_rows, target=32):
    """Largest multiple of 8 that divides tile_rows and is <= target."""
    best = 8
    s = 8
    while s <= min(target, tile_rows):
        if tile_rows % s == 0:
            best = s
        s += 8
    return max(8, min(best, tile_rows))


def _pick_inner_unroll(n_sub, target=8):
    """Largest divisor of n_sub that is <= target (inner unroll factor)."""
    best = 1
    for d in range(1, min(target, n_sub) + 1):
        if n_sub % d == 0:
            best = d
    return best


def _chip_config():
    """Returns (default_tile_rows, default_n_parallel, vmem_budget_bytes)."""
    vmem_cap = 128 << 20
    try:
        vmem_cap = int(pltpu.get_tpu_info().vmem_capacity_bytes)
    except Exception:  # old jax / interpret mode: fall back to v6e-like values
        pass
    if vmem_cap <= (65 << 20):
        # v7x-like: 64 MiB VMEM per TensorCore, 2 TensorCores per chip.
        return 2048, 2, 48 << 20
    # v5e / v6e: 128 MiB VMEM, single TensorCore.
    return 4096, 1, 100 << 20


def _rd_loss_kernel(c_ref, k_ref,
                    r1_ref, r2_ref, r3_ref, r4_ref, r5_ref,
                    d1_ref, d2_ref, d3_ref, d4_ref, d5_ref,
                    out_ref, *,
                    tile_rows, sub_rows, inner_unroll,
                    steps_per_core, total_rows, needs_mask):
    cpid = pl.program_id(0)          # "parallel" (per-TensorCore) axis
    ipid = pl.program_id(1)          # sequential reduction axis

    # Per-core resident (1, sub_rows, 128) f32 accumulator: zero on first step.
    @pl.when(ipid == 0)
    def _():
        out_ref[...] = jnp.zeros_like(out_ref)

    lanes = c_ref.shape[-1]
    n_sub = tile_rows // sub_rows
    n_outer = n_sub // inner_unroll
    # Unclamped global first row of this grid step; duplicate (clamped) steps
    # get block_row0 >= total_rows and are fully masked to zero.
    block_row0 = (cpid * steps_per_core + ipid) * tile_rows

    pairs = ((r1_ref, d1_ref), (r2_ref, d2_ref), (r3_ref, d3_ref),
             (r4_ref, d4_ref), (r5_ref, d5_ref))

    def tile_partial(masked):
        # Iota hoisted out of the sub-chunk loop; only traced for the masked
        # branch, which only *executes* on boundary / duplicate steps.
        row_iota = (lax.broadcasted_iota(jnp.int32, (sub_rows, lanes), 0)
                    if masked else None)

        def process_chunk(s, acc):
            start = s * sub_rows
            if not isinstance(start, int):
                start = pl.multiple_of(start, sub_rows)
            c = c_ref[pl.ds(start, sub_rows), :].astype(jnp.float32)
            k = k_ref[pl.ds(start, sub_rows), :].astype(jnp.float32)
            err = jnp.zeros((sub_rows, lanes), jnp.float32)
            for r_ref, d_ref in pairs:
                pred = c + k * jnp.log(
                    r_ref[pl.ds(start, sub_rows), :].astype(jnp.float32))
                err = err + jnp.abs(
                    pred - d_ref[pl.ds(start, sub_rows), :].astype(jnp.float32))
            if masked:
                grow = block_row0 + s * sub_rows + row_iota
                # Must remain a select: garbage/NaN rows of a partial block are
                # simply discarded.  Never convert to `err * mask`.
                err = jnp.where(grow < total_rows, err, jnp.float32(0.0))
            return acc + err

        init = jnp.zeros((sub_rows, lanes), jnp.float32)

        def outer_body(o, acc):
            for j in range(inner_unroll):
                acc = process_chunk(o * inner_unroll + j, acc)
            return acc

        if n_outer == 1:
            return outer_body(0, init)
        return lax.fori_loop(0, n_outer, outer_body, init)

    if not needs_mask:
        out_ref[...] += tile_partial(False)[None, :, :]
    else:
        is_full = block_row0 + tile_rows <= total_rows

        @pl.when(is_full)                      # interior steps: no mask work
        def _():
            out_ref[...] += tile_partial(False)[None, :, :]

        @pl.when(jnp.logical_not(is_full))     # boundary / duplicate steps
        def _():
            out_ref[...] += tile_partial(True)[None, :, :]


@functools.partial(jax.jit, static_argnames=("tile_rows", "n_parallel"))
def rd_loss(C, K, R1, R2, R3, R4, R5, D1, D2, D3, D4, D5, *,
            tile_rows=None, n_parallel=None):
    """sum_i mean(|C + K*log(Ri) - Di|) for i = 1..5 (RDLoss.forward)."""
    flats = [x.reshape(-1) for x in (C, K, R1, R2, R3, R4, R5,
                                     D1, D2, D3, D4, D5)]
    n_elems = flats[0].shape[0]

    def_tr, def_np, vmem_budget = _chip_config()
    req_tr = def_tr if tile_rows is None else max(8, _round_up(int(tile_rows), 8))
    req_np = def_np if n_parallel is None else max(1, int(n_parallel))

    # 8x128-aligned bulk goes through the kernel; the (<1024-element) ragged
    # tail is handled with plain jnp below.  When n_elems is already aligned
    # the reshape is free (no copy).
    kernel_rows = (n_elems // _LANES) // 8 * 8
    kernel_elems = kernel_rows * _LANES
    tail_elems = n_elems - kernel_elems

    total = jnp.float32(0.0)

    if kernel_rows > 0:
        if tail_elems:
            # TODO(synk): this prefix slice still costs one copy of the bulk
            # for ragged inputs; a fully zero-copy ragged path would need 1-D
            # BlockSpecs with element-level masking.
            ins = [f[:kernel_elems].reshape(kernel_rows, _LANES) for f in flats]
        else:
            ins = [f.reshape(kernel_rows, _LANES) for f in flats]

        tr = min(req_tr, kernel_rows)

        def db_bytes(t):   # double-buffered input bytes for tile height t
            return sum(2 * t * _LANES * f.dtype.itemsize for f in flats)

        headroom = 4 << 20
        while tr > 8 and db_bytes(tr) + headroom > vmem_budget:
            tr = max(8, _round_up(tr // 2, 8))

        n_blocks = pl.cdiv(kernel_rows, tr)
        npar = max(1, min(req_np, n_blocks))
        spc = pl.cdiv(n_blocks, npar)                 # sequential steps / core
        needs_clamp = (npar * spc) != n_blocks
        needs_mask = needs_clamp or (kernel_rows % tr != 0)

        sub_rows = _pick_sub_rows(tr)
        inner = _pick_inner_unroll(tr // sub_rows)

        if needs_clamp:
            # Duplicate (out-of-range) steps re-read the last valid block; the
            # kernel masks their contribution to exactly zero.
            in_map = lambda c, i: (jnp.minimum(c * spc + i, n_blocks - 1), 0)
        else:
            in_map = lambda c, i: (c * spc + i, 0)

        out_block = sub_rows * _LANES * 4
        vmem_limit = int(max(min(db_bytes(tr) + 2 * out_block + headroom,
                                 vmem_budget), 16 << 20))

        cost = pl.CostEstimate(
            flops=25 * kernel_elems,
            transcendentals=5 * kernel_elems,
            bytes_accessed=int(sum(kernel_elems * f.dtype.itemsize
                                   for f in flats) + npar * out_block))

        kernel = functools.partial(
            _rd_loss_kernel,
            tile_rows=tr, sub_rows=sub_rows, inner_unroll=inner,
            steps_per_core=spc, total_rows=kernel_rows, needs_mask=needs_mask)

        partials = pl.pallas_call(
            kernel,
            out_shape=jax.ShapeDtypeStruct((npar, sub_rows, _LANES),
                                           jnp.float32),
            grid_spec=pltpu.PrefetchScalarGridSpec(
                num_scalar_prefetch=0,
                grid=(npar, spc),
                in_specs=[pl.BlockSpec((tr, _LANES), in_map)] * 12,
                out_specs=pl.BlockSpec((1, sub_rows, _LANES),
                                       lambda c, i: (c, 0, 0))),
            compiler_params=pltpu.CompilerParams(
                dimension_semantics=("parallel", "arbitrary"),
                vmem_limit_bytes=vmem_limit),
            cost_estimate=cost,
        )(*ins)

        total = total + jnp.sum(partials)

    if tail_elems:
        tails = [f[kernel_elems:].astype(jnp.float32) for f in flats]
        c_t, k_t = tails[0], tails[1]
        for idx in range(5):
            pred = c_t + k_t * jnp.log(tails[2 + idx])
            total = total + jnp.sum(jnp.abs(pred - tails[7 + idx]))

    # Sum of 5 per-tensor means; all tensors share the same element count.
    return total / jnp.float32(n_elems)


def _reference(C, K, R1, R2, R3, R4, R5, D1, D2, D3, D4, D5):
    def l1(a, b):
        return jnp.mean(jnp.abs(a - b))
    preds = [C + K * jnp.log(R) for R in (R1, R2, R3, R4, R5)]
    return sum(l1(p, d) for p, d in zip(preds, (D1, D2, D3, D4, D5)))


def _make_inputs(shape, seed):
    keys = jax.random.split(jax.random.PRNGKey(seed), 12)
    C = jax.random.normal(keys[0], shape, jnp.float32)
    K = jax.random.normal(keys[1], shape, jnp.float32)
    # R inputs must be strictly positive (they go through log).
    Rs = [jax.random.uniform(keys[2 + i], shape, jnp.float32, 0.5, 2.0)
          for i in range(5)]
    Ds = [jax.random.normal(keys[7 + i], shape, jnp.float32) for i in range(5)]
    return (C, K, *Rs, *Ds)


def _check(args, **kw):
    out = jax.block_until_ready(rd_loss(*args, **kw))
    ref = _reference(*args)
    assert jnp.allclose(out, ref, rtol=1e-5, atol=1e-5), (out, ref)


if __name__ == "__main__":
    # 1) Canonical small NCHW case (2048 elems = 16 aligned rows): zero-copy
    #    path, chip-default tile / parallel configuration.
    _check(_make_inputs((2, 4, 16, 16), 0))

    # 2) Ragged element count (1768 = 8 aligned rows + 744-element tail):
    #    exercises the bulk/tail split.
    _check(_make_inputs((2, 4, 17, 13), 1))

    # 3) Many blocks split across 2 "cores" with an odd block count:
    #    exercises the parallel axis, index clamping and duplicate-step mask.
    _check(_make_inputs((2, 4, 11, 128), 2), tile_rows=8, n_parallel=2)

    # 4) Partial last block (320 rows, tile 96): boundary-only masked path.
    args4 = _make_inputs((2, 4, 40, 128), 3)
    _check(args4, tile_rows=96, n_parallel=1)

    # 5) Large single tile (320 rows): exercises the outer fori_loop with an
    #    unrolled inner body and the vector accumulator over many sub-chunks.
    _check(args4, tile_rows=320, n_parallel=1)

    print("KERNEL_OK")
</pallas_src>

<mosaic_0001>
module attributes {stable_mosaic.version = 11 : i64} {
  func.func @_rd_loss_kernel(%arg0: i32, %arg1: i32, %arg2: memref<16x128xf32, #tpu.memory_space<vmem>>, %arg3: memref<16x128xf32, #tpu.memory_space<vmem>>, %arg4: memref<16x128xf32, #tpu.memory_space<vmem>>, %arg5: memref<16x128xf32, #tpu.memory_space<vmem>>, %arg6: memref<16x128xf32, #tpu.memory_space<vmem>>, %arg7: memref<16x128xf32, #tpu.memory_space<vmem>>, %arg8: memref<16x128xf32, #tpu.memory_space<vmem>>, %arg9: memref<16x128xf32, #tpu.memory_space<vmem>>, %arg10: memref<16x128xf32, #tpu.memory_space<vmem>>, %arg11: memref<16x128xf32, #tpu.memory_space<vmem>>, %arg12: memref<16x128xf32, #tpu.memory_space<vmem>>, %arg13: memref<16x128xf32, #tpu.memory_space<vmem>>, %arg14: memref<1x16x128xf32, #tpu.memory_space<vmem>>) attributes {dimension_semantics = [#tpu.dimension_semantics<parallel>, #tpu.dimension_semantics<arbitrary>], iteration_bounds = array<i64: 1, 1>, scalar_prefetch = 0 : i64, scratch_operands = 0 : i64, tpu.core_type = #tpu.core_type<tc>, window_params = [{transform_indices = @transform_0, window_bounds = array<i64: 16, 128>}, {transform_indices = @transform_1, window_bounds = array<i64: 16, 128>}, {transform_indices = @transform_2, window_bounds = array<i64: 16, 128>}, {transform_indices = @transform_3, window_bounds = array<i64: 16, 128>}, {transform_indices = @transform_4, window_bounds = array<i64: 16, 128>}, {transform_indices = @transform_5, window_bounds = array<i64: 16, 128>}, {transform_indices = @transform_6, window_bounds = array<i64: 16, 128>}, {transform_indices = @transform_7, window_bounds = array<i64: 16, 128>}, {transform_indices = @transform_8, window_bounds = array<i64: 16, 128>}, {transform_indices = @transform_9, window_bounds = array<i64: 16, 128>}, {transform_indices = @transform_10, window_bounds = array<i64: 16, 128>}, {transform_indices = @transform_11, window_bounds = array<i64: 16, 128>}, {transform_indices = @transform_12, window_bounds = array<i64: 1, 16, 128>}]} {
    %c0_i32 = arith.constant 0 : i32
    %0 = arith.cmpi eq, %arg1, %c0_i32 : i32
    %1 = arith.extui %0 : i1 to i32
    %c0_i32_0 = arith.constant 0 : i32
    %2 = arith.cmpi ne, %1, %c0_i32_0 : i32
    scf.if %2 {
      %cst_31 = arith.constant 0.000000e+00 : f32
      %52 = vector.broadcast %cst_31 : f32 to vector<1x16x128xf32>
      %c0_32 = arith.constant 0 : index
      %c0_33 = arith.constant 0 : index
      %c0_34 = arith.constant 0 : index
      %53 = vector.load %arg14[%c0_32, %c0_33, %c0_34] : memref<1x16x128xf32, #tpu.memory_space<vmem>>, vector<1x16x128xf32>
      tpu.vector_store %arg14[%c0_32, %c0_33, %c0_34], %52 {strides = array<i32>} : memref<1x16x128xf32, #tpu.memory_space<vmem>>, vector<1x16x128xf32>,
    } else {
    }
    %c0 = arith.constant 0 : index
    %c0_1 = arith.constant 0 : index
    %c0_2 = arith.constant 0 : index
    %3 = vector.load %arg14[%c0, %c0_1, %c0_2] : memref<1x16x128xf32, #tpu.memory_space<vmem>>, vector<1x16x128xf32>
    %cst = arith.constant 0.000000e+00 : f32
    %4 = vector.broadcast %cst : f32 to vector<16x128xf32>
    %c0_3 = arith.constant 0 : index
    %c0_4 = arith.constant 0 : index
    %5 = vector.load %arg2[%c0_3, %c0_4] : memref<16x128xf32, #tpu.memory_space<vmem>>, vector<16x128xf32>
    %c0_5 = arith.constant 0 : index
    %c0_6 = arith.constant 0 : index
    %6 = vector.load %arg3[%c0_5, %c0_6] : memref<16x128xf32, #tpu.memory_space<vmem>>, vector<16x128xf32>
    %cst_7 = arith.constant 0.000000e+00 : f32
    %7 = vector.broadcast %cst_7 : f32 to vector<16x128xf32>
    %c0_8 = arith.constant 0 : index
    %c0_9 = arith.constant 0 : index
    %8 = vector.load %arg4[%c0_8, %c0_9] : memref<16x128xf32, #tpu.memory_space<vmem>>, vector<16x128xf32>
    %9 = math.log %8 : vector<16x128xf32>
    %10 = arith.mulf %6, %9 : vector<16x128xf32>
    %11 = arith.addf %5, %10 : vector<16x128xf32>
    %c0_10 = arith.constant 0 : index
    %c0_11 = arith.constant 0 : index
    %12 = vector.load %arg9[%c0_10, %c0_11] : memref<16x128xf32, #tpu.memory_space<vmem>>, vector<16x128xf32>
    %13 = arith.subf %11, %12 : vector<16x128xf32>
    %14 = math.absf %13 : vector<16x128xf32>
    %15 = arith.addf %7, %14 : vector<16x128xf32>
    %c0_12 = arith.constant 0 : index
    %c0_13 = arith.constant 0 : index
    %16 = vector.load %arg5[%c0_12, %c0_13] : memref<16x128xf32, #tpu.memory_space<vmem>>, vector<16x128xf32>
    %17 = math.log %16 : vector<16x128xf32>
    %18 = arith.mulf %6, %17 : vector<16x128xf32>
    %19 = arith.addf %5, %18 : vector<16x128xf32>
    %c0_14 = arith.constant 0 : index
    %c0_15 = arith.constant 0 : index
    %20 = vector.load %arg10[%c0_14, %c0_15] : memref<16x128xf32, #tpu.memory_space<vmem>>, vector<16x128xf32>
    %21 = arith.subf %19, %20 : vector<16x128xf32>
    %22 = math.absf %21 : vector<16x128xf32>
    %23 = arith.addf %15, %22 : vector<16x128xf32>
    %c0_16 = arith.constant 0 : index
    %c0_17 = arith.constant 0 : index
    %24 = vector.load %arg6[%c0_16, %c0_17] : memref<16x128xf32, #tpu.memory_space<vmem>>, vector<16x128xf32>
    %25 = math.log %24 : vector<16x128xf32>
    %26 = arith.mulf %6, %25 : vector<16x128xf32>
    %27 = arith.addf %5, %26 : vector<16x128xf32>
    %c0_18 = arith.constant 0 : index
    %c0_19 = arith.constant 0 : index
    %28 = vector.load %arg11[%c0_18, %c0_19] : memref<16x128xf32, #tpu.memory_space<vmem>>, vector<16x128xf32>
    %29 = arith.subf %27, %28 : vector<16x128xf32>
    %30 = math.absf %29 : vector<16x128xf32>
    %31 = arith.addf %23, %30 : vector<16x128xf32>
    %c0_20 = arith.constant 0 : index
    %c0_21 = arith.constant 0 : index
    %32 = vector.load %arg7[%c0_20, %c0_21] : memref<16x128xf32, #tpu.memory_space<vmem>>, vector<16x128xf32>
    %33 = math.log %32 : vector<16x128xf32>
    %34 = arith.mulf %6, %33 : vector<16x128xf32>
    %35 = arith.addf %5, %34 : vector<16x128xf32>
    %c0_22 = arith.constant 0 : index
    %c0_23 = arith.constant 0 : index
    %36 = vector.load %arg12[%c0_22, %c0_23] : memref<16x128xf32, #tpu.memory_space<vmem>>, vector<16x128xf32>
    %37 = arith.subf %35, %36 : vector<16x128xf32>
    %38 = math.absf %37 : vector<16x128xf32>
    %39 = arith.addf %31, %38 : vector<16x128xf32>
    %c0_24 = arith.constant 0 : index
    %c0_25 = arith.constant 0 : index
    %40 = vector.load %arg8[%c0_24, %c0_25] : memref<16x128xf32, #tpu.memory_space<vmem>>, vector<16x128xf32>
    %41 = math.log %40 : vector<16x128xf32>
    %42 = arith.mulf %6, %41 : vector<16x128xf32>
    %43 = arith.addf %5, %42 : vector<16x128xf32>
    %c0_26 = arith.constant 0 : index
    %c0_27 = arith.constant 0 : index
    %44 = vector.load %arg13[%c0_26, %c0_27] : memref<16x128xf32, #tpu.memory_space<vmem>>, vector<16x128xf32>
    %45 = arith.subf %43, %44 : vector<16x128xf32>
    %46 = math.absf %45 : vector<16x128xf32>
    %47 = arith.addf %39, %46 : vector<16x128xf32>
    %48 = arith.addf %4, %47 : vector<16x128xf32>
    %49 = vector.shape_cast %48 : vector<16x128xf32> to vector<1x16x128xf32>
    %50 = arith.addf %3, %49 : vector<1x16x128xf32>
    %c0_28 = arith.constant 0 : index
    %c0_29 = arith.constant 0 : index
    %c0_30 = arith.constant 0 : index
    %51 = vector.load %arg14[%c0_28, %c0_29, %c0_30] : memref<1x16x128xf32, #tpu.memory_space<vmem>>, vector<1x16x128xf32>
    tpu.vector_store %arg14[%c0_28, %c0_29, %c0_30], %50 {strides = array<i32>} : memref<1x16x128xf32, #tpu.memory_space<vmem>>, vector<1x16x128xf32>,
    return
  }
  func.func @transform_0(%arg0: i32, %arg1: i32) -> (i32, i32) {
    %c1_i32 = arith.constant 1 : i32
    %0 = arith.muli %arg0, %c1_i32 : i32
    %1 = arith.addi %0, %arg1 : i32
    %c0_i32 = arith.constant 0 : i32
    %c0_i32_0 = arith.constant 0 : i32
    return %1, %c0_i32 : i32, i32
  }
  func.func @transform_1(%arg0: i32, %arg1: i32) -> (i32, i32) {
    %c1_i32 = arith.constant 1 : i32
    %0 = arith.muli %arg0, %c1_i32 : i32
    %1 = arith.addi %0, %arg1 : i32
    %c0_i32 = arith.constant 0 : i32
    %c0_i32_0 = arith.constant 0 : i32
    return %1, %c0_i32 : i32, i32
  }
  func.func @transform_2(%arg0: i32, %arg1: i32) -> (i32, i32) {
    %c1_i32 = arith.constant 1 : i32
    %0 = arith.muli %arg0, %c1_i32 : i32
    %1 = arith.addi %0, %arg1 : i32
    %c0_i32 = arith.constant 0 : i32
    %c0_i32_0 = arith.constant 0 : i32
    return %1, %c0_i32 : i32, i32
  }
  func.func @transform_3(%arg0: i32, %arg1: i32) -> (i32, i32) {
    %c1_i32 = arith.constant 1 : i32
    %0 = arith.muli %arg0, %c1_i32 : i32
    %1 = arith.addi %0, %arg1 : i32
    %c0_i32 = arith.constant 0 : i32
    %c0_i32_0 = arith.constant 0 : i32
    return %1, %c0_i32 : i32, i32
  }
  func.func @transform_4(%arg0: i32, %arg1: i32) -> (i32, i32) {
    %c1_i32 = arith.constant 1 : i32
    %0 = arith.muli %arg0, %c1_i32 : i32
    %1 = arith.addi %0, %arg1 : i32
    %c0_i32 = arith.constant 0 : i32
    %c0_i32_0 = arith.constant 0 : i32
    return %1, %c0_i32 : i32, i32
  }
  func.func @transform_5(%arg0: i32, %arg1: i32) -> (i32, i32) {
    %c1_i32 = arith.constant 1 : i32
    %0 = arith.muli %arg0, %c1_i32 : i32
    %1 = arith.addi %0, %arg1 : i32
    %c0_i32 = arith.constant 0 : i32
    %c0_i32_0 = arith.constant 0 : i32
    return %1, %c0_i32 : i32, i32
  }
  func.func @transform_6(%arg0: i32, %arg1: i32) -> (i32, i32) {
    %c1_i32 = arith.constant 1 : i32
    %0 = arith.muli %arg0, %c1_i32 : i32
    %1 = arith.addi %0, %arg1 : i32
    %c0_i32 = arith.constant 0 : i32
    %c0_i32_0 = arith.constant 0 : i32
    return %1, %c0_i32 : i32, i32
  }
  func.func @transform_7(%arg0: i32, %arg1: i32) -> (i32, i32) {
    %c1_i32 = arith.constant 1 : i32
    %0 = arith.muli %arg0, %c1_i32 : i32
    %1 = arith.addi %0, %arg1 : i32
    %c0_i32 = arith.constant 0 : i32
    %c0_i32_0 = arith.constant 0 : i32
    return %1, %c0_i32 : i32, i32
  }
  func.func @transform_8(%arg0: i32, %arg1: i32) -> (i32, i32) {
    %c1_i32 = arith.constant 1 : i32
    %0 = arith.muli %arg0, %c1_i32 : i32
    %1 = arith.addi %0, %arg1 : i32
    %c0_i32 = arith.constant 0 : i32
    %c0_i32_0 = arith.constant 0 : i32
    return %1, %c0_i32 : i32, i32
  }
  func.func @transform_9(%arg0: i32, %arg1: i32) -> (i32, i32) {
    %c1_i32 = arith.constant 1 : i32
    %0 = arith.muli %arg0, %c1_i32 : i32
    %1 = arith.addi %0, %arg1 : i32
    %c0_i32 = arith.constant 0 : i32
    %c0_i32_0 = arith.constant 0 : i32
    return %1, %c0_i32 : i32, i32
  }
  func.func @transform_10(%arg0: i32, %arg1: i32) -> (i32, i32) {
    %c1_i32 = arith.constant 1 : i32
    %0 = arith.muli %arg0, %c1_i32 : i32
    %1 = arith.addi %0, %arg1 : i32
    %c0_i32 = arith.constant 0 : i32
    %c0_i32_0 = arith.constant 0 : i32
    return %1, %c0_i32 : i32, i32
  }
  func.func @transform_11(%arg0: i32, %arg1: i32) -> (i32, i32) {
    %c1_i32 = arith.constant 1 : i32
    %0 = arith.muli %arg0, %c1_i32 : i32
    %1 = arith.addi %0, %arg1 : i32
    %c0_i32 = arith.constant 0 : i32
    %c0_i32_0 = arith.constant 0 : i32
    return %1, %c0_i32 : i32, i32
  }
  func.func @transform_12(%arg0: i32, %arg1: i32) -> (i32, i32, i32) {
    %c0_i32 = arith.constant 0 : i32
    %c0_i32_0 = arith.constant 0 : i32
    %c0_i32_1 = arith.constant 0 : i32
    return %arg0, %c0_i32, %c0_i32_0 : i32, i32, i32
  }
}

</mosaic_0001>

<bundles_post_ra>
// kernel: rd_loss.1
= control target key start
LH: loop header
LB: loop body
LE: loop exit
PB: predicated region body
PF: predicated region fallthrough
CT: control target
= control target key end

     0   :  { %s653_s2 = inlined_call_operand.vmem [shape: f32[16,128], index: 2, kind: input, shape index: {}]   ;;  %s654_s3 = inlined_call_operand.vmem [shape: f32[16,128], index: 3, kind: input, shape index: {}]   ;;  %s655_s4 = inlined_call_operand.vmem [shape: f32[16,128], index: 4, kind: input, shape index: {}]   ;;  %s656_s5 = inlined_call_operand.vmem [shape: f32[16,128], index: 5, kind: input, shape index: {}]   ;;  %s657_s6 = inlined_call_operand.vmem [shape: f32[16,128], index: 6, kind: input, shape index: {}]   ;;  %s658_s1 = inlined_call_operand.vmem [shape: f32[16,128], index: 1, kind: input, shape index: {}]   ;;  %s659_s0 = inlined_call_operand.vmem [shape: f32[16,128], index: 0, kind: input, shape index: {}]   ;;  %s660_s7 = inlined_call_operand.vmem [shape: f32[16,128], index: 7, kind: input, shape index: {}]   ;;  %s661_s8 = inlined_call_operand.vmem [shape: f32[16,128], index: 8, kind: input, shape index: {}]   ;;  %s662_s9 = inlined_call_operand.vmem [shape: f32[16,128], index: 9, kind: input, shape index: {}]   ;;  %s663_s10 = inlined_call_operand.vmem [shape: f32[16,128], index: 10, kind: input, shape index: {}]   ;;  %s664_s11 = inlined_call_operand.vmem [shape: f32[16,128], index: 11, kind: input, shape index: {}]   ;;  %s665_s12 = inlined_call_operand.vmem [shape: f32[1,16,128], index: 12, kind: output, shape index: {}]  }
   0x1   :  { %v317_v0 = vld [vmem:[%s653_s2] sm:$0xff]  ;;  %v318_v5 = vld [vmem:[%s653_s2 + $0x8] sm:$0xff] }
   0x2   :  { %490 = vlog2.f32 %v317_v0  ;;  %v335_v1 = vld [vmem:[%s654_s3] sm:$0xff]  ;;  %v336_v6 = vld [vmem:[%s654_s3 + $0x8] sm:$0xff] }
   0x3   :  { %492 = vlog2.f32 %v335_v1  ;;  %v353_v2 = vld [vmem:[%s655_s4] sm:$0xff]  ;;  %v354_v7 = vld [vmem:[%s655_s4 + $0x8] sm:$0xff] }
   0x4   :  { %v371_v3 = vld [vmem:[%s656_s5] sm:$0xff]  ;;  %494 = vlog2.f32 %v353_v2  ;;  %v372_v8 = vld [vmem:[%s656_s5 + $0x8] sm:$0xff] }
   0x5   :  { %v389_v4 = vld [vmem:[%s657_s6] sm:$0xff]  ;;  %496 = vlog2.f32 %v371_v3  ;;  %v390_v13 = vld [vmem:[%s657_s6 + $0x8] sm:$0xff] }
   0x6   :  { %498 = vlog2.f32 %v389_v4  ;;  %v315_v10 = vld [vmem:[%s658_s1] sm:$0xff]  ;;  %v316_v29 = vld [vmem:[%s658_s1 + $0x8] sm:$0xff] }
   0x7   :  { %500 = vlog2.f32 %v318_v5  ;;  %v313_v15 = vld [vmem:[%s659_s0] sm:$0xff]  ;;  %v314_v40 = vld [vmem:[%s659_s0 + $0x8] sm:$0xff] }
   0x8   :  { %v491_v9 = vpop.eup %490  ;;  %502 = vlog2.f32 %v336_v6  ;;  %v327_v21 = vld [vmem:[%s660_s7] sm:$0xff]  ;;  %v328_v51 = vld [vmem:[%s660_s7 + $0x8] sm:$0xff] }
   0x9   :  { %v493_v11 = vpop.eup %492  ;;  %v320_v12 = vmul.f32 0.6931472, %v491_v9  ;;  %504 = vlog2.f32 %v354_v7  ;;  %v345_v26 = vld [vmem:[%s661_s8] sm:$0xff]  ;;  %v346_v57 = vld [vmem:[%s661_s8 + $0x8] sm:$0xff] }
   0xa   :  { %v495_v14 = vpop.eup %494  ;;  %v338_v16 = vmul.f32 0.6931472, %v493_v11  ;;  %506 = vlog2.f32 %v372_v8  ;;  %v363_v32 = vld [vmem:[%s662_s9] sm:$0xff]  ;;  %v364_v62 = vld [vmem:[%s662_s9 + $0x8] sm:$0xff] }
   0xb   :  { %v497_v17 = vpop.eup %496  ;;  %v323_v18 = vmul.f32 %v320_v12, %v315_v10  ;;  %v356_v19 = vmul.f32 0.6931472, %v495_v14  ;;  %508 = vlog2.f32 %v390_v13  ;;  %v381_v38 = vld [vmem:[%s663_s10] sm:$0xff]  ;;  %v382_v11 = vld [vmem:[%s663_s10 + $0x8] sm:$0xff] }
   0xc   :  { %v499_v20 = vpop.eup %498  ;;  %v341_v22 = vmul.f32 %v338_v16, %v315_v10  ;;  %v374_v23 = vmul.f32 0.6931472, %v497_v17  ;;  %v399_v45 = vld [vmem:[%s664_s11] sm:$0xff]  ;;  %v400_v17 = vld [vmem:[%s664_s11 + $0x8] sm:$0xff] }
   0xd   :  { %v501_v24 = vpop.eup %500  ;;  %v325_v25 = vadd.f32 %v323_v18, %v313_v15  ;;  %v359_v27 = vmul.f32 %v356_v19, %v315_v10  ;;  %v392_v28 = vmul.f32 0.6931472, %v499_v20 }
   0xe   :  { %v503_v30 = vpop.eup %502  ;;  %v343_v31 = vadd.f32 %v341_v22, %v313_v15  ;;  %v377_v33 = vmul.f32 %v374_v23, %v315_v10  ;;  %v322_v34 = vmul.f32 0.6931472, %v501_v24 }
   0xf   :  { %v505_v35 = vpop.eup %504  ;;  %v329_v36 = vsub.f32 %v325_v25, %v327_v21  ;;  %v361_v37 = vadd.f32 %v359_v27, %v313_v15  ;;  %v395_v39 = vmul.f32 %v392_v28, %v315_v10  ;;  %v340_v41 = vmul.f32 0.6931472, %v503_v30 }
  0x10   :  { %v507_v42 = vpop.eup %506  ;;  %v347_v43 = vsub.f32 %v343_v31, %v345_v26  ;;  %v379_v44 = vadd.f32 %v377_v33, %v313_v15  ;;  %v324_v46 = vmul.f32 %v322_v34, %v316_v29  ;;  %v358_v47 = vmul.f32 0.6931472, %v505_v35 }
  0x11   :  { %v331_v48 = vand.u32 2147483647, %v329_v36  ;;  %v365_v49 = vsub.f32 %v361_v37, %v363_v32  ;;  %v397_v50 = vadd.f32 %v395_v39, %v313_v15  ;;  %v342_v52 = vmul.f32 %v340_v41, %v316_v29  ;;  %v509_v53 = vpop.eup %508 }
  0x12   :  { %v349_v54 = vand.u32 2147483647, %v347_v43  ;;  %v383_v55 = vsub.f32 %v379_v44, %v381_v38  ;;  %v326_v56 = vadd.f32 %v324_v46, %v314_v40  ;;  %v360_v58 = vmul.f32 %v358_v47, %v316_v29 }
  0x13   :  { %v367_v59 = vand.u32 2147483647, %v365_v49  ;;  %v401_v60 = vsub.f32 %v397_v50, %v399_v45  ;;  %v344_v61 = vadd.f32 %v342_v52, %v314_v40  ;;  %v376_v63 = vmul.f32 0.6931472, %v507_v42 }
  0x14   :  { %v351_v0 = vadd.f32 %v349_v54, %v331_v48  ;;  %v385_v1 = vand.u32 2147483647, %v383_v55  ;;  %v330_v2 = vsub.f32 %v326_v56, %v328_v51  ;;  %v362_v3 = vadd.f32 %v360_v58, %v314_v40 }
  0x15   :  { %v348_v4 = vsub.f32 %v344_v61, %v346_v57  ;;  %v378_v5 = vmul.f32 %v376_v63, %v316_v29  ;;  %v394_v6 = vmul.f32 0.6931472, %v509_v53  ;;  %v403_v8 = vand.u32 2147483647, %v401_v60 }
  0x16   :  { %v369_v7 = vadd.f32 %v367_v59, %v351_v0  ;;  %v332_v9 = vand.u32 2147483647, %v330_v2  ;;  %v366_v10 = vsub.f32 %v362_v3, %v364_v62 }
  0x17   :  { %v350_v12 = vand.u32 2147483647, %v348_v4  ;;  %v380_v13 = vadd.f32 %v378_v5, %v314_v40  ;;  %v396_v14 = vmul.f32 %v394_v6, %v316_v29 }
  0x18   :  { %v387_v15 = vadd.f32 %v385_v1, %v369_v7  ;;  %v368_v16 = vand.u32 2147483647, %v366_v10 }
  0x19   :  { %v352_v18 = vadd.f32 %v350_v12, %v332_v9  ;;  %v384_v19 = vsub.f32 %v380_v13, %v382_v11  ;;  %v398_v20 = vadd.f32 %v396_v14, %v314_v40 }
  0x1a   :  { %v405_v21 = vadd.f32 %v403_v8, %v387_v15 }
  0x1b   :  { %v370_v22 = vadd.f32 %v368_v16, %v352_v18  ;;  %v386_v23 = vand.u32 2147483647, %v384_v19  ;;  %v402_v24 = vsub.f32 %v398_v20, %v400_v17 }
  0x1c   :  { %411 = vst [vmem:[%s665_s12] sm:$0xff] %v405_v21 }
  0x1d   :  { %v388_v25 = vadd.f32 %v386_v23, %v370_v22  ;;  %v404_v26 = vand.u32 2147483647, %v402_v24 }
  0x1f   :  { %v406_v27 = vadd.f32 %v404_v26, %v388_v25 }
  0x21   :  { %412 = vst [vmem:[%s665_s12 + $0x8] sm:$0xff] %v406_v27 }

</bundles_post_ra>
